<compile_context>
chip_gen: v7x
topology: tpu7x:2x2x1
jax: 0.10.0
libtpu: 0.0.40
codegen_flags: <defaults>
</compile_context>

<pallas_src>
from collections import OrderedDict
from functools import partial

import jax
import jax.numpy as jnp
from jax.experimental import pallas as pl
from jax.experimental.pallas import tpu as pltpu

_GAMMA = 2.0          # focal gamma (assumed; baked in as the explicit square)
_ALPHA = 0.25         # focal alpha (assumed)
_LOG_CLAMP = -100.0   # torch.nn.BCELoss clamps log() at -100


def _u2net_loss_kernel(d1_ref, d2_ref, d3_ref, d4_ref, label_ref,
                       out_ref, acc_ref, *, inv_total, tm, n,
                       assume_binary_labels):
    """One (tm, n) row tile of all four predictions vs. the shared label tile.

    grid = (nsplit, tiles_per_split):
      axis 0 ("parallel")  : megacore split over disjoint row ranges
      axis 1 ("arbitrary") : reduction sweep over this split's tiles
    acc_ref : VMEM (4, 3, acc_rows, n) f32 vector accumulators
              [prediction, (bce, focal, l1)], stored un-negated.
    out_ref : SMEM (4, 3) block of the (nsplit*4, 3) output (partial means).
    """
    t = pl.program_id(1)

    @pl.when(t == 0)
    def _init():
        acc_ref[...] = jnp.zeros_like(acc_ref)

    def tile_partial(x):
        # Collapse the tile's rows onto 8 sublanes with pure VPU adds.  The
        # (tm, n) -> (tm//8, 8, n) reshape never crosses an (8,128) tile, so
        # it is free; no XLU cross-lane reduction happens per grid step.
        if tm % 8 == 0 and tm > 8:
            return jnp.sum(x.reshape(tm // 8, 8, n), axis=0)
        return x

    # Loop-invariant label terms (hoisted; shared by all four predictions).
    y = label_ref[...].astype(jnp.float32)
    # alpha*y + (1-alpha)*(1-y) folded to (2*alpha-1)*y + (1-alpha).
    w = (2.0 * _ALPHA - 1.0) * y + (1.0 - _ALPHA)
    if not assume_binary_labels:
        one_m_y = 1.0 - y

    for k, pred_ref in enumerate((d1_ref, d2_ref, d3_ref, d4_ref)):
        p = pred_ref[...].astype(jnp.float32)
        l1 = jnp.abs(p - y)

        if assume_binary_labels:
            # For y in {0,1}: pt = 1 - |p - y|  =>  single EUP log covers both
            # BCE and focal.  (Deviates from the 2-log form only when p is
            # within ~1e-7 of the wrong label value; exact otherwise.)
            pt = 1.0 - l1
            log_pt = jnp.maximum(jnp.log(pt), _LOG_CLAMP)
            bce_raw = log_pt                         # bce   = -mean(log_pt)
            focal_raw = w * (l1 * l1) * log_pt       # focal = -mean(w*(1-pt)^2*log_pt)
        else:
            # Soft-label fallback: explicit 3-log formulation.
            log_p = jnp.maximum(jnp.log(p), _LOG_CLAMP)
            log_1mp = jnp.maximum(jnp.log(1.0 - p), _LOG_CLAMP)
            pt = p * y + (1.0 - p) * one_m_y
            log_pt = jnp.maximum(jnp.log(pt), _LOG_CLAMP)
            one_m_pt = 1.0 - pt
            bce_raw = y * log_p + one_m_y * log_1mp
            focal_raw = w * (one_m_pt * one_m_pt) * log_pt

        acc_ref[k, 0] += tile_partial(bce_raw)
        acc_ref[k, 1] += tile_partial(focal_raw)
        acc_ref[k, 2] += tile_partial(l1)

    @pl.when(t == pl.num_programs(1) - 1)
    def _finalize():
        # One cross-lane reduction per metric per split (12 total per split),
        # instead of 12 per grid step.  Negations folded into the scale.
        for k in range(4):
            out_ref[k, 0] = -inv_total * jnp.sum(acc_ref[k, 0])
            out_ref[k, 1] = -inv_total * jnp.sum(acc_ref[k, 1])
            out_ref[k, 2] = inv_total * jnp.sum(acc_ref[k, 2])


def _vmem_capacity_bytes():
    """Best-effort per-core VMEM capacity query (fallback: 128 MiB)."""
    default = 128 * 1024 * 1024
    try:
        info = pltpu.get_tpu_info()
        for name in ("vmem_capacity_bytes", "vmem_size_bytes", "vmem_bytes"):
            val = getattr(info, name, None)
            if val:
                return int(val)
    except Exception:
        pass
    return default


def _plan_layout(total):
    """Lane-dense (rows, lanes) slab for `total` elements -> (m, n, pad)."""
    if total % 128 == 0:
        best_small = None
        for n in (1024, 512, 256, 128):
            if total % n:
                continue
            m = total // n
            if m >= 8 and m % 8 == 0:
                return m, n, 0            # clean 8-row-aligned tiling, no copy
            if best_small is None:
                best_small = (m, n)
        if best_small is not None and best_small[0] <= 64:
            return best_small[0], best_small[1], 0   # tiny map: one full block
    # Rare fallback: zero-pad flattened maps to a 16x128-aligned slab.
    # (p = y = 0 padding contributes exactly zero BCE / focal / L1.)
    n = 128
    padded = -(-total // (16 * n)) * (16 * n)
    return padded // n, n, padded - total


def _choose_row_tile(m, n, target_elems, row_step):
    """Largest TM dividing m with TM % row_step == 0 and TM*n <= target.

    Prefers TM values giving an EVEN tile count so the 2-way megacore split
    is always available.
    """
    if m <= row_step or m % 8:
        return m                                    # single full-height block
    step = row_step if m % row_step == 0 else 8
    max_tm = max(step, min(m, target_elems // max(n, 1)))
    best_any = best_even = None
    tm = step
    while tm <= max_tm:
        if m % tm == 0:
            best_any = tm
            if (m // tm) % 2 == 0:
                best_even = tm
        tm += step
    return best_even or best_any or m


def u2net_loss_v7(pred, batch, *, assume_binary_labels=True,
                  max_tile_elems=None, input_buffer_count=None):
    """JAX/Pallas equivalent of U2NetLossV7.forward.

    pred  : dict with 'd1'..'d4' probability maps (any float dtype; bf16 is
            cheapest -- the cast to f32 happens per tile in-kernel).
    batch : dict with 'label' of the same shape (cast in-kernel; the data
            pipeline may emit bf16/uint8 labels to save HBM bandwidth).
    """
    d1, d2, d3, d4 = pred["d1"], pred["d2"], pred["d3"], pred["d4"]
    label = batch["label"]
    maps = (d1, d2, d3, d4, label)

    total = int(label.size)
    m, n, pad = _plan_layout(total)
    if pad == 0:
        slabs = [x.reshape(m, n) for x in maps]      # metadata-only reshape
    else:
        slabs = [jnp.pad(x.reshape(-1), (0, pad)).reshape(m, n) for x in maps]

    # Generation-aware tiling: ~512K-element tiles on 128 MiB-VMEM parts
    # (v5e/v6e), ~256K on 64 MiB parts (v7x).
    vmem_cap = _vmem_capacity_bytes()
    if max_tile_elems is None:
        max_tile_elems = (512 if vmem_cap >= (96 << 20) else 256) * 1024
    sub32 = any(jnp.dtype(x.dtype).itemsize < 4 for x in (d1, d2, d3, d4))
    row_step = 16 if (sub32 and m % 16 == 0) else 8   # bf16 packs 2 rows/sublane
    tm = _choose_row_tile(m, n, max_tile_elems, row_step)
    num_tiles = m // tm
    acc_rows = 8 if tm % 8 == 0 else tm

    # 2-way "parallel" split (true megacore split on v7x; harmless serial
    # loop on single-TC v5e/v6e).
    nsplit = 2 if (num_tiles % 2 == 0 and num_tiles >= 2) else 1
    tiles_per_split = num_tiles // nsplit

    kernel = partial(
        _u2net_loss_kernel,
        inv_total=1.0 / float(total),
        tm=tm, n=n,
        assume_binary_labels=assume_binary_labels,
    )

    def row_map(s, t, tps=tiles_per_split):
        return (s * tps + t, 0)

    spec_kwargs = {}
    if input_buffer_count is not None:              # optional deeper buffering (v5e)
        spec_kwargs["pipeline_mode"] = pl.Buffered(input_buffer_count)
    in_specs = [pl.BlockSpec((tm, n), row_map, **spec_kwargs) for _ in slabs]

    # VMEM budget derived from actual tile bytes (double-buffered inputs +
    # vector accumulators + headroom), capped by the chip's capacity.
    tile_bytes = tm * n * sum(jnp.dtype(x.dtype).itemsize for x in maps)
    acc_bytes = 4 * 3 * max(acc_rows, 8) * n * 4
    need = 2 * tile_bytes + acc_bytes + (4 << 20)
    vmem_limit = min(max(need, 32 << 20), max((3 * vmem_cap) // 4, need))

    partial_losses = pl.pallas_call(
        kernel,
        out_shape=jax.ShapeDtypeStruct((nsplit * 4, 3), jnp.float32),
        grid=(nsplit, tiles_per_split),
        in_specs=in_specs,
        out_specs=pl.BlockSpec((4, 3), lambda s, t: (s, 0),
                               memory_space=pltpu.SMEM),
        scratch_shapes=[pltpu.VMEM((4, 3, acc_rows, n), jnp.float32)],
        compiler_params=pltpu.CompilerParams(
            dimension_semantics=("parallel", "arbitrary"),
            vmem_limit_bytes=int(vmem_limit),
        ),
    )(*slabs)

    # Each split already scaled its partial SUM by the GLOBAL 1/total, so the
    # per-split partial means add exactly.
    losses = jnp.sum(partial_losses.reshape(nsplit, 4, 3), axis=0)  # (4, 3)

    d_bce = [losses[k, 0] for k in range(4)]
    d_focal = [losses[k, 1] for k in range(4)]
    d_l1 = [losses[k, 2] for k in range(4)]

    bce_loss = d_bce[0] + d_bce[1] + d_bce[2] + d_bce[3]
    focal_loss = d_focal[0] + d_focal[1] + d_focal[2] + d_focal[3]
    l1_loss = d_l1[0] + d_l1[1] + d_l1[2] + d_l1[3]
    total_loss = bce_loss + focal_loss + l1_loss

    # Metric keys mirror the original module verbatim (incl. its d2_l2/d3_l3/d4_l4 names).
    metrics = OrderedDict(
        d1_bce=d_bce[0], d2_bce=d_bce[1], d3_bce=d_bce[2], d4_bce=d_bce[3],
        bce_loss=bce_loss,
        d1_focal=d_focal[0], d2_focal=d_focal[1], d3_focal=d_focal[2],
        d4_focal=d_focal[3], focal_loss=focal_loss,
        d1_l1=d_l1[0], d2_l2=d_l1[1], d3_l3=d_l1[2], d4_l4=d_l1[3],
        l1_loss=l1_loss, total_loss=total_loss,
    )
    return total_loss, metrics


def _reference(pred, batch):
    """Pure-JAX reference (explicit 3-log formulation) for validation."""
    y = batch["label"].astype(jnp.float32)
    bce_l = focal_l = l1_l = 0.0
    for k in ("d1", "d2", "d3", "d4"):
        p = pred[k].astype(jnp.float32)
        bce = jnp.mean(-(y * jnp.maximum(jnp.log(p), _LOG_CLAMP)
                         + (1 - y) * jnp.maximum(jnp.log(1 - p), _LOG_CLAMP)))
        pt = p * y + (1 - p) * (1 - y)
        w = _ALPHA * y + (1 - _ALPHA) * (1 - y)
        focal = jnp.mean(-w * (1 - pt) ** 2 * jnp.maximum(jnp.log(pt), _LOG_CLAMP))
        l1 = jnp.mean(jnp.abs(p - y))
        bce_l = bce_l + bce
        focal_l = focal_l + focal
        l1_l = l1_l + l1
    return bce_l + focal_l + l1_l, bce_l, focal_l, l1_l


if __name__ == "__main__":
    def _make_inputs(key, shape, pred_dtype, binary_label=True):
        ks = jax.random.split(key, 5)
        pred = {
            f"d{i + 1}": jax.nn.sigmoid(
                jax.random.normal(ks[i], shape, jnp.float32)).astype(pred_dtype)
            for i in range(4)
        }
        if binary_label:
            lbl = (jax.random.uniform(ks[4], shape) > 0.5).astype(jnp.float32)
        else:
            lbl = jax.random.uniform(ks[4], shape, jnp.float32)
        return pred, {"label": lbl}

    key = jax.random.PRNGKey(0)
    k_a, k_b, k_c = jax.random.split(key, 3)

    # Case A: tiny map (single degenerate block), f32 predictions.
    pred_a, batch_a = _make_inputs(k_a, (2, 1, 16, 16), jnp.float32)
    tot_a, met_a = u2net_loss_v7(pred_a, batch_a)
    tot_a = jax.block_until_ready(tot_a)
    ref_a = _reference(pred_a, batch_a)
    assert jnp.allclose(tot_a, ref_a[0], rtol=2e-4, atol=1e-5), (tot_a, ref_a[0])
    for got, want in zip(
            (met_a["bce_loss"], met_a["focal_loss"], met_a["l1_loss"]), ref_a[1:]):
        assert jnp.allclose(got, want, rtol=2e-4, atol=1e-5), (got, want)

    # Case B: bf16 predictions; forced small tiles -> multi-step reduction
    # sweep (tiles_per_split > 1) + 2-way parallel split.
    pred_b, batch_b = _make_inputs(k_b, (2, 1, 256, 256), jnp.bfloat16)
    tot_b, met_b = u2net_loss_v7(pred_b, batch_b, max_tile_elems=16 * 1024)
    tot_b = jax.block_until_ready(tot_b)
    ref_b = _reference(pred_b, batch_b)
    assert jnp.allclose(tot_b, ref_b[0], rtol=2e-4, atol=1e-4), (tot_b, ref_b[0])
    for got, want in zip(
            (met_b["bce_loss"], met_b["focal_loss"], met_b["l1_loss"]), ref_b[1:]):
        assert jnp.allclose(got, want, rtol=2e-4, atol=1e-4), (got, want)

    # Case B2: same inputs with the generation-aware default tiling.
    tot_b2, _ = u2net_loss_v7(pred_b, batch_b)
    tot_b2 = jax.block_until_ready(tot_b2)
    assert jnp.allclose(tot_b2, ref_b[0], rtol=2e-4, atol=1e-4), (tot_b2, ref_b[0])

    # Case C: soft labels -> explicit 3-log fallback path.
    pred_c, batch_c = _make_inputs(k_c, (2, 1, 32, 32), jnp.float32,
                                   binary_label=False)
    tot_c, _ = u2net_loss_v7(pred_c, batch_c, assume_binary_labels=False)
    tot_c = jax.block_until_ready(tot_c)
    ref_c = _reference(pred_c, batch_c)
    assert jnp.allclose(tot_c, ref_c[0], rtol=2e-4, atol=1e-5), (tot_c, ref_c[0])

    print("KERNEL_OK")
</pallas_src>

<mosaic_0001>
module attributes {stable_mosaic.version = 11 : i64} {
  func.func @_u2net_loss_kernel(%arg0: i32, %arg1: i32, %arg2: memref<1x512xf32, #tpu.memory_space<vmem>>, %arg3: memref<1x512xf32, #tpu.memory_space<vmem>>, %arg4: memref<1x512xf32, #tpu.memory_space<vmem>>, %arg5: memref<1x512xf32, #tpu.memory_space<vmem>>, %arg6: memref<1x512xf32, #tpu.memory_space<vmem>>, %arg7: memref<4x3xf32, #tpu.memory_space<smem>>, %arg8: memref<4x3x1x512xf32, #tpu.memory_space<vmem>>) attributes {dimension_semantics = [#tpu.dimension_semantics<parallel>, #tpu.dimension_semantics<arbitrary>], iteration_bounds = array<i64: 1, 1>, scalar_prefetch = 0 : i64, scratch_operands = 1 : i64, tpu.core_type = #tpu.core_type<tc>, window_params = [{transform_indices = @transform_0, window_bounds = array<i64: 1, 512>}, {transform_indices = @transform_1, window_bounds = array<i64: 1, 512>}, {transform_indices = @transform_2, window_bounds = array<i64: 1, 512>}, {transform_indices = @transform_3, window_bounds = array<i64: 1, 512>}, {transform_indices = @transform_4, window_bounds = array<i64: 1, 512>}, {transform_indices = @transform_5, window_bounds = array<i64: 4, 3>}]} {
    %c0_i32 = arith.constant 0 : i32
    %0 = arith.cmpi eq, %arg1, %c0_i32 : i32
    %1 = arith.extui %0 : i1 to i32
    %c0_i32_0 = arith.constant 0 : i32
    %2 = arith.cmpi ne, %1, %c0_i32_0 : i32
    scf.if %2 {
      %cst_114 = arith.constant 0.000000e+00 : f32
      %127 = vector.broadcast %cst_114 : f32 to vector<4x3x1x512xf32>
      %c0_115 = arith.constant 0 : index
      %c0_116 = arith.constant 0 : index
      %c0_117 = arith.constant 0 : index
      %c0_118 = arith.constant 0 : index
      %128 = vector.load %arg8[%c0_115, %c0_116, %c0_117, %c0_118] : memref<4x3x1x512xf32, #tpu.memory_space<vmem>>, vector<4x3x1x512xf32>
      tpu.vector_store %arg8[%c0_115, %c0_116, %c0_117, %c0_118], %127 {strides = array<i32>} : memref<4x3x1x512xf32, #tpu.memory_space<vmem>>, vector<4x3x1x512xf32>,
    } else {
    }
    %c0 = arith.constant 0 : index
    %c0_1 = arith.constant 0 : index
    %3 = vector.load %arg6[%c0, %c0_1] : memref<1x512xf32, #tpu.memory_space<vmem>>, vector<1x512xf32>
    %cst = arith.constant -5.000000e-01 : f32
    %4 = vector.broadcast %cst : f32 to vector<1x512xf32>
    %5 = arith.mulf %4, %3 : vector<1x512xf32>
    %cst_2 = arith.constant 7.500000e-01 : f32
    %6 = vector.broadcast %cst_2 : f32 to vector<1x512xf32>
    %7 = arith.addf %5, %6 : vector<1x512xf32>
    %c0_3 = arith.constant 0 : index
    %c0_4 = arith.constant 0 : index
    %8 = vector.load %arg2[%c0_3, %c0_4] : memref<1x512xf32, #tpu.memory_space<vmem>>, vector<1x512xf32>
    %9 = arith.subf %8, %3 : vector<1x512xf32>
    %10 = math.absf %9 : vector<1x512xf32>
    %cst_5 = arith.constant 1.000000e+00 : f32
    %11 = vector.broadcast %cst_5 : f32 to vector<1x512xf32>
    %12 = arith.subf %11, %10 : vector<1x512xf32>
    %13 = math.log %12 : vector<1x512xf32>
    %cst_6 = arith.constant -1.000000e+02 : f32
    %14 = vector.broadcast %cst_6 : f32 to vector<1x512xf32>
    %15 = arith.maximumf %13, %14 : vector<1x512xf32>
    %16 = arith.mulf %10, %10 : vector<1x512xf32>
    %17 = arith.mulf %7, %16 : vector<1x512xf32>
    %18 = arith.mulf %17, %15 : vector<1x512xf32>
    %c0_7 = arith.constant 0 : index
    %c0_8 = arith.constant 0 : index
    %c0_9 = arith.constant 0 : index
    %c0_10 = arith.constant 0 : index
    %19 = vector.load %arg8[%c0_7, %c0_8, %c0_9, %c0_10] : memref<4x3x1x512xf32, #tpu.memory_space<vmem>>, vector<1x1x1x512xf32>
    %20 = vector.shape_cast %19 : vector<1x1x1x512xf32> to vector<1x512xf32>
    %21 = arith.addf %20, %15 : vector<1x512xf32>
    %c0_11 = arith.constant 0 : index
    %c0_12 = arith.constant 0 : index
    %c0_13 = arith.constant 0 : index
    %c0_14 = arith.constant 0 : index
    %22 = vector.load %arg8[%c0_11, %c0_12, %c0_13, %c0_14] : memref<4x3x1x512xf32, #tpu.memory_space<vmem>>, vector<1x1x1x512xf32>
    %23 = vector.shape_cast %22 : vector<1x1x1x512xf32> to vector<1x512xf32>
    %24 = vector.shape_cast %21 : vector<1x512xf32> to vector<1x1x1x512xf32>
    tpu.vector_store %arg8[%c0_11, %c0_12, %c0_13, %c0_14], %24 {strides = array<i32>} : memref<4x3x1x512xf32, #tpu.memory_space<vmem>>, vector<1x1x1x512xf32>,
    %c0_15 = arith.constant 0 : index
    %c1 = arith.constant 1 : index
    %c0_16 = arith.constant 0 : index
    %c0_17 = arith.constant 0 : index
    %25 = vector.load %arg8[%c0_15, %c1, %c0_16, %c0_17] : memref<4x3x1x512xf32, #tpu.memory_space<vmem>>, vector<1x1x1x512xf32>
    %26 = vector.shape_cast %25 : vector<1x1x1x512xf32> to vector<1x512xf32>
    %27 = arith.addf %26, %18 : vector<1x512xf32>
    %c0_18 = arith.constant 0 : index
    %c1_19 = arith.constant 1 : index
    %c0_20 = arith.constant 0 : index
    %c0_21 = arith.constant 0 : index
    %28 = vector.load %arg8[%c0_18, %c1_19, %c0_20, %c0_21] : memref<4x3x1x512xf32, #tpu.memory_space<vmem>>, vector<1x1x1x512xf32>
    %29 = vector.shape_cast %28 : vector<1x1x1x512xf32> to vector<1x512xf32>
    %30 = vector.shape_cast %27 : vector<1x512xf32> to vector<1x1x1x512xf32>
    tpu.vector_store %arg8[%c0_18, %c1_19, %c0_20, %c0_21], %30 {strides = array<i32>} : memref<4x3x1x512xf32, #tpu.memory_space<vmem>>, vector<1x1x1x512xf32>,
    %c0_22 = arith.constant 0 : index
    %c2 = arith.constant 2 : index
    %c0_23 = arith.constant 0 : index
    %c0_24 = arith.constant 0 : index
    %31 = vector.load %arg8[%c0_22, %c2, %c0_23, %c0_24] : memref<4x3x1x512xf32, #tpu.memory_space<vmem>>, vector<1x1x1x512xf32>
    %32 = vector.shape_cast %31 : vector<1x1x1x512xf32> to vector<1x512xf32>
    %33 = arith.addf %32, %10 : vector<1x512xf32>
    %c0_25 = arith.constant 0 : index
    %c2_26 = arith.constant 2 : index
    %c0_27 = arith.constant 0 : index
    %c0_28 = arith.constant 0 : index
    %34 = vector.load %arg8[%c0_25, %c2_26, %c0_27, %c0_28] : memref<4x3x1x512xf32, #tpu.memory_space<vmem>>, vector<1x1x1x512xf32>
    %35 = vector.shape_cast %34 : vector<1x1x1x512xf32> to vector<1x512xf32>
    %36 = vector.shape_cast %33 : vector<1x512xf32> to vector<1x1x1x512xf32>
    tpu.vector_store %arg8[%c0_25, %c2_26, %c0_27, %c0_28], %36 {strides = array<i32>} : memref<4x3x1x512xf32, #tpu.memory_space<vmem>>, vector<1x1x1x512xf32>,
    %c0_29 = arith.constant 0 : index
    %c0_30 = arith.constant 0 : index
    %37 = vector.load %arg3[%c0_29, %c0_30] : memref<1x512xf32, #tpu.memory_space<vmem>>, vector<1x512xf32>
    %38 = arith.subf %37, %3 : vector<1x512xf32>
    %39 = math.absf %38 : vector<1x512xf32>
    %cst_31 = arith.constant 1.000000e+00 : f32
    %40 = vector.broadcast %cst_31 : f32 to vector<1x512xf32>
    %41 = arith.subf %40, %39 : vector<1x512xf32>
    %42 = math.log %41 : vector<1x512xf32>
    %cst_32 = arith.constant -1.000000e+02 : f32
    %43 = vector.broadcast %cst_32 : f32 to vector<1x512xf32>
    %44 = arith.maximumf %42, %43 : vector<1x512xf32>
    %45 = arith.mulf %39, %39 : vector<1x512xf32>
    %46 = arith.mulf %7, %45 : vector<1x512xf32>
    %47 = arith.mulf %46, %44 : vector<1x512xf32>
    %c1_33 = arith.constant 1 : index
    %c0_34 = arith.constant 0 : index
    %c0_35 = arith.constant 0 : index
    %c0_36 = arith.constant 0 : index
    %48 = vector.load %arg8[%c1_33, %c0_34, %c0_35, %c0_36] : memref<4x3x1x512xf32, #tpu.memory_space<vmem>>, vector<1x1x1x512xf32>
    %49 = vector.shape_cast %48 : vector<1x1x1x512xf32> to vector<1x512xf32>
    %50 = arith.addf %49, %44 : vector<1x512xf32>
    %c1_37 = arith.constant 1 : index
    %c0_38 = arith.constant 0 : index
    %c0_39 = arith.constant 0 : index
    %c0_40 = arith.constant 0 : index
    %51 = vector.load %arg8[%c1_37, %c0_38, %c0_39, %c0_40] : memref<4x3x1x512xf32, #tpu.memory_space<vmem>>, vector<1x1x1x512xf32>
    %52 = vector.shape_cast %51 : vector<1x1x1x512xf32> to vector<1x512xf32>
    %53 = vector.shape_cast %50 : vector<1x512xf32> to vector<1x1x1x512xf32>
    tpu.vector_store %arg8[%c1_37, %c0_38, %c0_39, %c0_40], %53 {strides = array<i32>} : memref<4x3x1x512xf32, #tpu.memory_space<vmem>>, vector<1x1x1x512xf32>,
    %c1_41 = arith.constant 1 : index
    %c1_42 = arith.constant 1 : index
    %c0_43 = arith.constant 0 : index
    %c0_44 = arith.constant 0 : index
    %54 = vector.load %arg8[%c1_41, %c1_42, %c0_43, %c0_44] : memref<4x3x1x512xf32, #tpu.memory_space<vmem>>, vector<1x1x1x512xf32>
    %55 = vector.shape_cast %54 : vector<1x1x1x512xf32> to vector<1x512xf32>
    %56 = arith.addf %55, %47 : vector<1x512xf32>
    %c1_45 = arith.constant 1 : index
    %c1_46 = arith.constant 1 : index
    %c0_47 = arith.constant 0 : index
    %c0_48 = arith.constant 0 : index
    %57 = vector.load %arg8[%c1_45, %c1_46, %c0_47, %c0_48] : memref<4x3x1x512xf32, #tpu.memory_space<vmem>>, vector<1x1x1x512xf32>
    %58 = vector.shape_cast %57 : vector<1x1x1x512xf32> to vector<1x512xf32>
    %59 = vector.shape_cast %56 : vector<1x512xf32> to vector<1x1x1x512xf32>
    tpu.vector_store %arg8[%c1_45, %c1_46, %c0_47, %c0_48], %59 {strides = array<i32>} : memref<4x3x1x512xf32, #tpu.memory_space<vmem>>, vector<1x1x1x512xf32>,
    %c1_49 = arith.constant 1 : index
    %c2_50 = arith.constant 2 : index
    %c0_51 = arith.constant 0 : index
    %c0_52 = arith.constant 0 : index
    %60 = vector.load %arg8[%c1_49, %c2_50, %c0_51, %c0_52] : memref<4x3x1x512xf32, #tpu.memory_space<vmem>>, vector<1x1x1x512xf32>
    %61 = vector.shape_cast %60 : vector<1x1x1x512xf32> to vector<1x512xf32>
    %62 = arith.addf %61, %39 : vector<1x512xf32>
    %c1_53 = arith.constant 1 : index
    %c2_54 = arith.constant 2 : index
    %c0_55 = arith.constant 0 : index
    %c0_56 = arith.constant 0 : index
    %63 = vector.load %arg8[%c1_53, %c2_54, %c0_55, %c0_56] : memref<4x3x1x512xf32, #tpu.memory_space<vmem>>, vector<1x1x1x512xf32>
    %64 = vector.shape_cast %63 : vector<1x1x1x512xf32> to vector<1x512xf32>
    %65 = vector.shape_cast %62 : vector<1x512xf32> to vector<1x1x1x512xf32>
    tpu.vector_store %arg8[%c1_53, %c2_54, %c0_55, %c0_56], %65 {strides = array<i32>} : memref<4x3x1x512xf32, #tpu.memory_space<vmem>>, vector<1x1x1x512xf32>,
    %c0_57 = arith.constant 0 : index
    %c0_58 = arith.constant 0 : index
    %66 = vector.load %arg4[%c0_57, %c0_58] : memref<1x512xf32, #tpu.memory_space<vmem>>, vector<1x512xf32>
    %67 = arith.subf %66, %3 : vector<1x512xf32>
    %68 = math.absf %67 : vector<1x512xf32>
    %cst_59 = arith.constant 1.000000e+00 : f32
    %69 = vector.broadcast %cst_59 : f32 to vector<1x512xf32>
    %70 = arith.subf %69, %68 : vector<1x512xf32>
    %71 = math.log %70 : vector<1x512xf32>
    %cst_60 = arith.constant -1.000000e+02 : f32
    %72 = vector.broadcast %cst_60 : f32 to vector<1x512xf32>
    %73 = arith.maximumf %71, %72 : vector<1x512xf32>
    %74 = arith.mulf %68, %68 : vector<1x512xf32>
    %75 = arith.mulf %7, %74 : vector<1x512xf32>
    %76 = arith.mulf %75, %73 : vector<1x512xf32>
    %c2_61 = arith.constant 2 : index
    %c0_62 = arith.constant 0 : index
    %c0_63 = arith.constant 0 : index
    %c0_64 = arith.constant 0 : index
    %77 = vector.load %arg8[%c2_61, %c0_62, %c0_63, %c0_64] : memref<4x3x1x512xf32, #tpu.memory_space<vmem>>, vector<1x1x1x512xf32>
    %78 = vector.shape_cast %77 : vector<1x1x1x512xf32> to vector<1x512xf32>
    %79 = arith.addf %78, %73 : vector<1x512xf32>
    %c2_65 = arith.constant 2 : index
    %c0_66 = arith.constant 0 : index
    %c0_67 = arith.constant 0 : index
    %c0_68 = arith.constant 0 : index
    %80 = vector.load %arg8[%c2_65, %c0_66, %c0_67, %c0_68] : memref<4x3x1x512xf32, #tpu.memory_space<vmem>>, vector<1x1x1x512xf32>
    %81 = vector.shape_cast %80 : vector<1x1x1x512xf32> to vector<1x512xf32>
    %82 = vector.shape_cast %79 : vector<1x512xf32> to vector<1x1x1x512xf32>
    tpu.vector_store %arg8[%c2_65, %c0_66, %c0_67, %c0_68], %82 {strides = array<i32>} : memref<4x3x1x512xf32, #tpu.memory_space<vmem>>, vector<1x1x1x512xf32>,
    %c2_69 = arith.constant 2 : index
    %c1_70 = arith.constant 1 : index
    %c0_71 = arith.constant 0 : index
    %c0_72 = arith.constant 0 : index
    %83 = vector.load %arg8[%c2_69, %c1_70, %c0_71, %c0_72] : memref<4x3x1x512xf32, #tpu.memory_space<vmem>>, vector<1x1x1x512xf32>
    %84 = vector.shape_cast %83 : vector<1x1x1x512xf32> to vector<1x512xf32>
    %85 = arith.addf %84, %76 : vector<1x512xf32>
    %c2_73 = arith.constant 2 : index
    %c1_74 = arith.constant 1 : index
    %c0_75 = arith.constant 0 : index
    %c0_76 = arith.constant 0 : index
    %86 = vector.load %arg8[%c2_73, %c1_74, %c0_75, %c0_76] : memref<4x3x1x512xf32, #tpu.memory_space<vmem>>, vector<1x1x1x512xf32>
    %87 = vector.shape_cast %86 : vector<1x1x1x512xf32> to vector<1x512xf32>
    %88 = vector.shape_cast %85 : vector<1x512xf32> to vector<1x1x1x512xf32>
    tpu.vector_store %arg8[%c2_73, %c1_74, %c0_75, %c0_76], %88 {strides = array<i32>} : memref<4x3x1x512xf32, #tpu.memory_space<vmem>>, vector<1x1x1x512xf32>,
    %c2_77 = arith.constant 2 : index
    %c2_78 = arith.constant 2 : index
    %c0_79 = arith.constant 0 : index
    %c0_80 = arith.constant 0 : index
    %89 = vector.load %arg8[%c2_77, %c2_78, %c0_79, %c0_80] : memref<4x3x1x512xf32, #tpu.memory_space<vmem>>, vector<1x1x1x512xf32>
    %90 = vector.shape_cast %89 : vector<1x1x1x512xf32> to vector<1x512xf32>
    %91 = arith.addf %90, %68 : vector<1x512xf32>
    %c2_81 = arith.constant 2 : index
    %c2_82 = arith.constant 2 : index
    %c0_83 = arith.constant 0 : index
    %c0_84 = arith.constant 0 : index
    %92 = vector.load %arg8[%c2_81, %c2_82, %c0_83, %c0_84] : memref<4x3x1x512xf32, #tpu.memory_space<vmem>>, vector<1x1x1x512xf32>
    %93 = vector.shape_cast %92 : vector<1x1x1x512xf32> to vector<1x512xf32>
    %94 = vector.shape_cast %91 : vector<1x512xf32> to vector<1x1x1x512xf32>
    tpu.vector_store %arg8[%c2_81, %c2_82, %c0_83, %c0_84], %94 {strides = array<i32>} : memref<4x3x1x512xf32, #tpu.memory_space<vmem>>, vector<1x1x1x512xf32>,
    %c0_85 = arith.constant 0 : index
    %c0_86 = arith.constant 0 : index
    %95 = vector.load %arg5[%c0_85, %c0_86] : memref<1x512xf32, #tpu.memory_space<vmem>>, vector<1x512xf32>
    %96 = arith.subf %95, %3 : vector<1x512xf32>
    %97 = math.absf %96 : vector<1x512xf32>
    %cst_87 = arith.constant 1.000000e+00 : f32
    %98 = vector.broadcast %cst_87 : f32 to vector<1x512xf32>
    %99 = arith.subf %98, %97 : vector<1x512xf32>
    %100 = math.log %99 : vector<1x512xf32>
    %cst_88 = arith.constant -1.000000e+02 : f32
    %101 = vector.broadcast %cst_88 : f32 to vector<1x512xf32>
    %102 = arith.maximumf %100, %101 : vector<1x512xf32>
    %103 = arith.mulf %97, %97 : vector<1x512xf32>
    %104 = arith.mulf %7, %103 : vector<1x512xf32>
    %105 = arith.mulf %104, %102 : vector<1x512xf32>
    %c3 = arith.constant 3 : index
    %c0_89 = arith.constant 0 : index
    %c0_90 = arith.constant 0 : index
    %c0_91 = arith.constant 0 : index
    %106 = vector.load %arg8[%c3, %c0_89, %c0_90, %c0_91] : memref<4x3x1x512xf32, #tpu.memory_space<vmem>>, vector<1x1x1x512xf32>
    %107 = vector.shape_cast %106 : vector<1x1x1x512xf32> to vector<1x512xf32>
    %108 = arith.addf %107, %102 : vector<1x512xf32>
    %c3_92 = arith.constant 3 : index
    %c0_93 = arith.constant 0 : index
    %c0_94 = arith.constant 0 : index
    %c0_95 = arith.constant 0 : index
    %109 = vector.load %arg8[%c3_92, %c0_93, %c0_94, %c0_95] : memref<4x3x1x512xf32, #tpu.memory_space<vmem>>, vector<1x1x1x512xf32>
    %110 = vector.shape_cast %109 : vector<1x1x1x512xf32> to vector<1x512xf32>
    %111 = vector.shape_cast %108 : vector<1x512xf32> to vector<1x1x1x512xf32>
    tpu.vector_store %arg8[%c3_92, %c0_93, %c0_94, %c0_95], %111 {strides = array<i32>} : memref<4x3x1x512xf32, #tpu.memory_space<vmem>>, vector<1x1x1x512xf32>,
    %c3_96 = arith.constant 3 : index
    %c1_97 = arith.constant 1 : index
    %c0_98 = arith.constant 0 : index
    %c0_99 = arith.constant 0 : index
    %112 = vector.load %arg8[%c3_96, %c1_97, %c0_98, %c0_99] : memref<4x3x1x512xf32, #tpu.memory_space<vmem>>, vector<1x1x1x512xf32>
    %113 = vector.shape_cast %112 : vector<1x1x1x512xf32> to vector<1x512xf32>
    %114 = arith.addf %113, %105 : vector<1x512xf32>
    %c3_100 = arith.constant 3 : index
    %c1_101 = arith.constant 1 : index
    %c0_102 = arith.constant 0 : index
    %c0_103 = arith.constant 0 : index
    %115 = vector.load %arg8[%c3_100, %c1_101, %c0_102, %c0_103] : memref<4x3x1x512xf32, #tpu.memory_space<vmem>>, vector<1x1x1x512xf32>
    %116 = vector.shape_cast %115 : vector<1x1x1x512xf32> to vector<1x512xf32>
    %117 = vector.shape_cast %114 : vector<1x512xf32> to vector<1x1x1x512xf32>
    tpu.vector_store %arg8[%c3_100, %c1_101, %c0_102, %c0_103], %117 {strides = array<i32>} : memref<4x3x1x512xf32, #tpu.memory_space<vmem>>, vector<1x1x1x512xf32>,
    %c3_104 = arith.constant 3 : index
    %c2_105 = arith.constant 2 : index
    %c0_106 = arith.constant 0 : index
    %c0_107 = arith.constant 0 : index
    %118 = vector.load %arg8[%c3_104, %c2_105, %c0_106, %c0_107] : memref<4x3x1x512xf32, #tpu.memory_space<vmem>>, vector<1x1x1x512xf32>
    %119 = vector.shape_cast %118 : vector<1x1x1x512xf32> to vector<1x512xf32>
    %120 = arith.addf %119, %97 : vector<1x512xf32>
    %c3_108 = arith.constant 3 : index
    %c2_109 = arith.constant 2 : index
    %c0_110 = arith.constant 0 : index
    %c0_111 = arith.constant 0 : index
    %121 = vector.load %arg8[%c3_108, %c2_109, %c0_110, %c0_111] : memref<4x3x1x512xf32, #tpu.memory_space<vmem>>, vector<1x1x1x512xf32>
    %122 = vector.shape_cast %121 : vector<1x1x1x512xf32> to vector<1x512xf32>
    %123 = vector.shape_cast %120 : vector<1x512xf32> to vector<1x1x1x512xf32>
    tpu.vector_store %arg8[%c3_108, %c2_109, %c0_110, %c0_111], %123 {strides = array<i32>} : memref<4x3x1x512xf32, #tpu.memory_space<vmem>>, vector<1x1x1x512xf32>,
    %c0_i32_112 = arith.constant 0 : i32
    %124 = arith.cmpi eq, %arg1, %c0_i32_112 : i32
    %125 = arith.extui %124 : i1 to i32
    %c0_i32_113 = arith.constant 0 : i32
    %126 = arith.cmpi ne, %125, %c0_i32_113 : i32
    scf.if %126 {
      %c0_114 = arith.constant 0 : index
      %c0_115 = arith.constant 0 : index
      %c0_116 = arith.constant 0 : index
      %c0_117 = arith.constant 0 : index
      %127 = vector.load %arg8[%c0_114, %c0_115, %c0_116, %c0_117] : memref<4x3x1x512xf32, #tpu.memory_space<vmem>>, vector<1x1x1x512xf32>
      %128 = vector.shape_cast %127 : vector<1x1x1x512xf32> to vector<1x512xf32>
      %129 = vector.shape_cast %128 : vector<1x512xf32> to vector<1x1x512xf32>
      %cst_118 = arith.constant dense<0.000000e+00> : vector<1xf32>
      %130 = vector.multi_reduction <add>, %129, %cst_118 [1, 2] : vector<1x1x512xf32> to vector<1xf32>
      %131 = vector.shape_cast %130 : vector<1xf32> to vector<1x1x1xf32>
      %132 = vector.extract %131[0, 0, 0] : f32 from vector<1x1x1xf32>
      %cst_119 = arith.constant -0.001953125 : f32
      %133 = arith.mulf %cst_119, %132 : f32
      %c0_120 = arith.constant 0 : index
      %c0_121 = arith.constant 0 : index
      %134 = memref.load %arg7[%c0_120, %c0_121] : memref<4x3xf32, #tpu.memory_space<smem>>
      memref.store %133, %arg7[%c0_120, %c0_121] : memref<4x3xf32, #tpu.memory_space<smem>>
      %c0_122 = arith.constant 0 : index
      %c1_123 = arith.constant 1 : index
      %c0_124 = arith.constant 0 : index
      %c0_125 = arith.constant 0 : index
      %135 = vector.load %arg8[%c0_122, %c1_123, %c0_124, %c0_125] : memref<4x3x1x512xf32, #tpu.memory_space<vmem>>, vector<1x1x1x512xf32>
      %136 = vector.shape_cast %135 : vector<1x1x1x512xf32> to vector<1x512xf32>
      %137 = vector.shape_cast %136 : vector<1x512xf32> to vector<1x1x512xf32>
      %cst_126 = arith.constant dense<0.000000e+00> : vector<1xf32>
      %138 = vector.multi_reduction <add>, %137, %cst_126 [1, 2] : vector<1x1x512xf32> to vector<1xf32>
      %139 = vector.shape_cast %138 : vector<1xf32> to vector<1x1x1xf32>
      %140 = vector.extract %139[0, 0, 0] : f32 from vector<1x1x1xf32>
      %cst_127 = arith.constant -0.001953125 : f32
      %141 = arith.mulf %cst_127, %140 : f32
      %c0_128 = arith.constant 0 : index
      %c1_129 = arith.constant 1 : index
      %142 = memref.load %arg7[%c0_128, %c1_129] : memref<4x3xf32, #tpu.memory_space<smem>>
      memref.store %141, %arg7[%c0_128, %c1_129] : memref<4x3xf32, #tpu.memory_space<smem>>
      %c0_130 = arith.constant 0 : index
      %c2_131 = arith.constant 2 : index
      %c0_132 = arith.constant 0 : index
      %c0_133 = arith.constant 0 : index
      %143 = vector.load %arg8[%c0_130, %c2_131, %c0_132, %c0_133] : memref<4x3x1x512xf32, #tpu.memory_space<vmem>>, vector<1x1x1x512xf32>
      %144 = vector.shape_cast %143 : vector<1x1x1x512xf32> to vector<1x512xf32>
      %145 = vector.shape_cast %144 : vector<1x512xf32> to vector<1x1x512xf32>
      %cst_134 = arith.constant dense<0.000000e+00> : vector<1xf32>
      %146 = vector.multi_reduction <add>, %145, %cst_134 [1, 2] : vector<1x1x512xf32> to vector<1xf32>
      %147 = vector.shape_cast %146 : vector<1xf32> to vector<1x1x1xf32>
      %148 = vector.extract %147[0, 0, 0] : f32 from vector<1x1x1xf32>
      %cst_135 = arith.constant 0.001953125 : f32
      %149 = arith.mulf %cst_135, %148 : f32
      %c0_136 = arith.constant 0 : index
      %c2_137 = arith.constant 2 : index
      %150 = memref.load %arg7[%c0_136, %c2_137] : memref<4x3xf32, #tpu.memory_space<smem>>
      memref.store %149, %arg7[%c0_136, %c2_137] : memref<4x3xf32, #tpu.memory_space<smem>>
      %c1_138 = arith.constant 1 : index
      %c0_139 = arith.constant 0 : index
      %c0_140 = arith.constant 0 : index
      %c0_141 = arith.constant 0 : index
      %151 = vector.load %arg8[%c1_138, %c0_139, %c0_140, %c0_141] : memref<4x3x1x512xf32, #tpu.memory_space<vmem>>, vector<1x1x1x512xf32>
      %152 = vector.shape_cast %151 : vector<1x1x1x512xf32> to vector<1x512xf32>
      %153 = vector.shape_cast %152 : vector<1x512xf32> to vector<1x1x512xf32>
      %cst_142 = arith.constant dense<0.000000e+00> : vector<1xf32>
      %154 = vector.multi_reduction <add>, %153, %cst_142 [1, 2] : vector<1x1x512xf32> to vector<1xf32>
      %155 = vector.shape_cast %154 : vector<1xf32> to vector<1x1x1xf32>
      %156 = vector.extract %155[0, 0, 0] : f32 from vector<1x1x1xf32>
      %cst_143 = arith.constant -0.001953125 : f32
      %157 = arith.mulf %cst_143, %156 : f32
      %c1_144 = arith.constant 1 : index
      %c0_145 = arith.constant 0 : index
      %158 = memref.load %arg7[%c1_144, %c0_145] : memref<4x3xf32, #tpu.memory_space<smem>>
      memref.store %157, %arg7[%c1_144, %c0_145] : memref<4x3xf32, #tpu.memory_space<smem>>
      %c1_146 = arith.constant 1 : index
      %c1_147 = arith.constant 1 : index
      %c0_148 = arith.constant 0 : index
      %c0_149 = arith.constant 0 : index
      %159 = vector.load %arg8[%c1_146, %c1_147, %c0_148, %c0_149] : memref<4x3x1x512xf32, #tpu.memory_space<vmem>>, vector<1x1x1x512xf32>
      %160 = vector.shape_cast %159 : vector<1x1x1x512xf32> to vector<1x512xf32>
      %161 = vector.shape_cast %160 : vector<1x512xf32> to vector<1x1x512xf32>
      %cst_150 = arith.constant dense<0.000000e+00> : vector<1xf32>
      %162 = vector.multi_reduction <add>, %161, %cst_150 [1, 2] : vector<1x1x512xf32> to vector<1xf32>
      %163 = vector.shape_cast %162 : vector<1xf32> to vector<1x1x1xf32>
      %164 = vector.extract %163[0, 0, 0] : f32 from vector<1x1x1xf32>
      %cst_151 = arith.constant -0.001953125 : f32
      %165 = arith.mulf %cst_151, %164 : f32
      %c1_152 = arith.constant 1 : index
      %c1_153 = arith.constant 1 : index
      %166 = memref.load %arg7[%c1_152, %c1_153] : memref<4x3xf32, #tpu.memory_space<smem>>
      memref.store %165, %arg7[%c1_152, %c1_153] : memref<4x3xf32, #tpu.memory_space<smem>>
      %c1_154 = arith.constant 1 : index
      %c2_155 = arith.constant 2 : index
      %c0_156 = arith.constant 0 : index
      %c0_157 = arith.constant 0 : index
      %167 = vector.load %arg8[%c1_154, %c2_155, %c0_156, %c0_157] : memref<4x3x1x512xf32, #tpu.memory_space<vmem>>, vector<1x1x1x512xf32>
      %168 = vector.shape_cast %167 : vector<1x1x1x512xf32> to vector<1x512xf32>
      %169 = vector.shape_cast %168 : vector<1x512xf32> to vector<1x1x512xf32>
      %cst_158 = arith.constant dense<0.000000e+00> : vector<1xf32>
      %170 = vector.multi_reduction <add>, %169, %cst_158 [1, 2] : vector<1x1x512xf32> to vector<1xf32>
      %171 = vector.shape_cast %170 : vector<1xf32> to vector<1x1x1xf32>
      %172 = vector.extract %171[0, 0, 0] : f32 from vector<1x1x1xf32>
      %cst_159 = arith.constant 0.001953125 : f32
      %173 = arith.mulf %cst_159, %172 : f32
      %c1_160 = arith.constant 1 : index
      %c2_161 = arith.constant 2 : index
      %174 = memref.load %arg7[%c1_160, %c2_161] : memref<4x3xf32, #tpu.memory_space<smem>>
      memref.store %173, %arg7[%c1_160, %c2_161] : memref<4x3xf32, #tpu.memory_space<smem>>
      %c2_162 = arith.constant 2 : index
      %c0_163 = arith.constant 0 : index
      %c0_164 = arith.constant 0 : index
      %c0_165 = arith.constant 0 : index
      %175 = vector.load %arg8[%c2_162, %c0_163, %c0_164, %c0_165] : memref<4x3x1x512xf32, #tpu.memory_space<vmem>>, vector<1x1x1x512xf32>
      %176 = vector.shape_cast %175 : vector<1x1x1x512xf32> to vector<1x512xf32>
      %177 = vector.shape_cast %176 : vector<1x512xf32> to vector<1x1x512xf32>
      %cst_166 = arith.constant dense<0.000000e+00> : vector<1xf32>
      %178 = vector.multi_reduction <add>, %177, %cst_166 [1, 2] : vector<1x1x512xf32> to vector<1xf32>
      %179 = vector.shape_cast %178 : vector<1xf32> to vector<1x1x1xf32>
      %180 = vector.extract %179[0, 0, 0] : f32 from vector<1x1x1xf32>
      %cst_167 = arith.constant -0.001953125 : f32
      %181 = arith.mulf %cst_167, %180 : f32
      %c2_168 = arith.constant 2 : index
      %c0_169 = arith.constant 0 : index
      %182 = memref.load %arg7[%c2_168, %c0_169] : memref<4x3xf32, #tpu.memory_space<smem>>
      memref.store %181, %arg7[%c2_168, %c0_169] : memref<4x3xf32, #tpu.memory_space<smem>>
      %c2_170 = arith.constant 2 : index
      %c1_171 = arith.constant 1 : index
      %c0_172 = arith.constant 0 : index
      %c0_173 = arith.constant 0 : index
      %183 = vector.load %arg8[%c2_170, %c1_171, %c0_172, %c0_173] : memref<4x3x1x512xf32, #tpu.memory_space<vmem>>, vector<1x1x1x512xf32>
      %184 = vector.shape_cast %183 : vector<1x1x1x512xf32> to vector<1x512xf32>
      %185 = vector.shape_cast %184 : vector<1x512xf32> to vector<1x1x512xf32>
      %cst_174 = arith.constant dense<0.000000e+00> : vector<1xf32>
      %186 = vector.multi_reduction <add>, %185, %cst_174 [1, 2] : vector<1x1x512xf32> to vector<1xf32>
      %187 = vector.shape_cast %186 : vector<1xf32> to vector<1x1x1xf32>
      %188 = vector.extract %187[0, 0, 0] : f32 from vector<1x1x1xf32>
      %cst_175 = arith.constant -0.001953125 : f32
      %189 = arith.mulf %cst_175, %188 : f32
      %c2_176 = arith.constant 2 : index
      %c1_177 = arith.constant 1 : index
      %190 = memref.load %arg7[%c2_176, %c1_177] : memref<4x3xf32, #tpu.memory_space<smem>>
      memref.store %189, %arg7[%c2_176, %c1_177] : memref<4x3xf32, #tpu.memory_space<smem>>
      %c2_178 = arith.constant 2 : index
      %c2_179 = arith.constant 2 : index
      %c0_180 = arith.constant 0 : index
      %c0_181 = arith.constant 0 : index
      %191 = vector.load %arg8[%c2_178, %c2_179, %c0_180, %c0_181] : memref<4x3x1x512xf32, #tpu.memory_space<vmem>>, vector<1x1x1x512xf32>
      %192 = vector.shape_cast %191 : vector<1x1x1x512xf32> to vector<1x512xf32>
      %193 = vector.shape_cast %192 : vector<1x512xf32> to vector<1x1x512xf32>
      %cst_182 = arith.constant dense<0.000000e+00> : vector<1xf32>
      %194 = vector.multi_reduction <add>, %193, %cst_182 [1, 2] : vector<1x1x512xf32> to vector<1xf32>
      %195 = vector.shape_cast %194 : vector<1xf32> to vector<1x1x1xf32>
      %196 = vector.extract %195[0, 0, 0] : f32 from vector<1x1x1xf32>
      %cst_183 = arith.constant 0.001953125 : f32
      %197 = arith.mulf %cst_183, %196 : f32
      %c2_184 = arith.constant 2 : index
      %c2_185 = arith.constant 2 : index
      %198 = memref.load %arg7[%c2_184, %c2_185] : memref<4x3xf32, #tpu.memory_space<smem>>
      memref.store %197, %arg7[%c2_184, %c2_185] : memref<4x3xf32, #tpu.memory_space<smem>>
      %c3_186 = arith.constant 3 : index
      %c0_187 = arith.constant 0 : index
      %c0_188 = arith.constant 0 : index
      %c0_189 = arith.constant 0 : index
      %199 = vector.load %arg8[%c3_186, %c0_187, %c0_188, %c0_189] : memref<4x3x1x512xf32, #tpu.memory_space<vmem>>, vector<1x1x1x512xf32>
      %200 = vector.shape_cast %199 : vector<1x1x1x512xf32> to vector<1x512xf32>
      %201 = vector.shape_cast %200 : vector<1x512xf32> to vector<1x1x512xf32>
      %cst_190 = arith.constant dense<0.000000e+00> : vector<1xf32>
      %202 = vector.multi_reduction <add>, %201, %cst_190 [1, 2] : vector<1x1x512xf32> to vector<1xf32>
      %203 = vector.shape_cast %202 : vector<1xf32> to vector<1x1x1xf32>
      %204 = vector.extract %203[0, 0, 0] : f32 from vector<1x1x1xf32>
      %cst_191 = arith.constant -0.001953125 : f32
      %205 = arith.mulf %cst_191, %204 : f32
      %c3_192 = arith.constant 3 : index
      %c0_193 = arith.constant 0 : index
      %206 = memref.load %arg7[%c3_192, %c0_193] : memref<4x3xf32, #tpu.memory_space<smem>>
      memref.store %205, %arg7[%c3_192, %c0_193] : memref<4x3xf32, #tpu.memory_space<smem>>
      %c3_194 = arith.constant 3 : index
      %c1_195 = arith.constant 1 : index
      %c0_196 = arith.constant 0 : index
      %c0_197 = arith.constant 0 : index
      %207 = vector.load %arg8[%c3_194, %c1_195, %c0_196, %c0_197] : memref<4x3x1x512xf32, #tpu.memory_space<vmem>>, vector<1x1x1x512xf32>
      %208 = vector.shape_cast %207 : vector<1x1x1x512xf32> to vector<1x512xf32>
      %209 = vector.shape_cast %208 : vector<1x512xf32> to vector<1x1x512xf32>
      %cst_198 = arith.constant dense<0.000000e+00> : vector<1xf32>
      %210 = vector.multi_reduction <add>, %209, %cst_198 [1, 2] : vector<1x1x512xf32> to vector<1xf32>
      %211 = vector.shape_cast %210 : vector<1xf32> to vector<1x1x1xf32>
      %212 = vector.extract %211[0, 0, 0] : f32 from vector<1x1x1xf32>
      %cst_199 = arith.constant -0.001953125 : f32
      %213 = arith.mulf %cst_199, %212 : f32
      %c3_200 = arith.constant 3 : index
      %c1_201 = arith.constant 1 : index
      %214 = memref.load %arg7[%c3_200, %c1_201] : memref<4x3xf32, #tpu.memory_space<smem>>
      memref.store %213, %arg7[%c3_200, %c1_201] : memref<4x3xf32, #tpu.memory_space<smem>>
      %c3_202 = arith.constant 3 : index
      %c2_203 = arith.constant 2 : index
      %c0_204 = arith.constant 0 : index
      %c0_205 = arith.constant 0 : index
      %215 = vector.load %arg8[%c3_202, %c2_203, %c0_204, %c0_205] : memref<4x3x1x512xf32, #tpu.memory_space<vmem>>, vector<1x1x1x512xf32>
      %216 = vector.shape_cast %215 : vector<1x1x1x512xf32> to vector<1x512xf32>
      %217 = vector.shape_cast %216 : vector<1x512xf32> to vector<1x1x512xf32>
      %cst_206 = arith.constant dense<0.000000e+00> : vector<1xf32>
      %218 = vector.multi_reduction <add>, %217, %cst_206 [1, 2] : vector<1x1x512xf32> to vector<1xf32>
      %219 = vector.shape_cast %218 : vector<1xf32> to vector<1x1x1xf32>
      %220 = vector.extract %219[0, 0, 0] : f32 from vector<1x1x1xf32>
      %cst_207 = arith.constant 0.001953125 : f32
      %221 = arith.mulf %cst_207, %220 : f32
      %c3_208 = arith.constant 3 : index
      %c2_209 = arith.constant 2 : index
      %222 = memref.load %arg7[%c3_208, %c2_209] : memref<4x3xf32, #tpu.memory_space<smem>>
      memref.store %221, %arg7[%c3_208, %c2_209] : memref<4x3xf32, #tpu.memory_space<smem>>
    } else {
    }
    return
  }
  func.func @transform_0(%arg0: i32, %arg1: i32) -> (i32, i32) {
    %c1_i32 = arith.constant 1 : i32
    %0 = arith.muli %arg0, %c1_i32 : i32
    %1 = arith.addi %0, %arg1 : i32
    %c0_i32 = arith.constant 0 : i32
    %c0_i32_0 = arith.constant 0 : i32
    return %1, %c0_i32 : i32, i32
  }
  func.func @transform_1(%arg0: i32, %arg1: i32) -> (i32, i32) {
    %c1_i32 = arith.constant 1 : i32
    %0 = arith.muli %arg0, %c1_i32 : i32
    %1 = arith.addi %0, %arg1 : i32
    %c0_i32 = arith.constant 0 : i32
    %c0_i32_0 = arith.constant 0 : i32
    return %1, %c0_i32 : i32, i32
  }
  func.func @transform_2(%arg0: i32, %arg1: i32) -> (i32, i32) {
    %c1_i32 = arith.constant 1 : i32
    %0 = arith.muli %arg0, %c1_i32 : i32
    %1 = arith.addi %0, %arg1 : i32
    %c0_i32 = arith.constant 0 : i32
    %c0_i32_0 = arith.constant 0 : i32
    return %1, %c0_i32 : i32, i32
  }
  func.func @transform_3(%arg0: i32, %arg1: i32) -> (i32, i32) {
    %c1_i32 = arith.constant 1 : i32
    %0 = arith.muli %arg0, %c1_i32 : i32
    %1 = arith.addi %0, %arg1 : i32
    %c0_i32 = arith.constant 0 : i32
    %c0_i32_0 = arith.constant 0 : i32
    return %1, %c0_i32 : i32, i32
  }
  func.func @transform_4(%arg0: i32, %arg1: i32) -> (i32, i32) {
    %c1_i32 = arith.constant 1 : i32
    %0 = arith.muli %arg0, %c1_i32 : i32
    %1 = arith.addi %0, %arg1 : i32
    %c0_i32 = arith.constant 0 : i32
    %c0_i32_0 = arith.constant 0 : i32
    return %1, %c0_i32 : i32, i32
  }
  func.func @transform_5(%arg0: i32, %arg1: i32) -> (i32, i32) {
    %c0_i32 = arith.constant 0 : i32
    %c0_i32_0 = arith.constant 0 : i32
    return %arg0, %c0_i32 : i32, i32
  }
}

</mosaic_0001>

<bundles_post_ra>
// kernel: tpu_custom_call.1
= control target key start
LH: loop header
LB: loop body
LE: loop exit
PB: predicated region body
PF: predicated region fallthrough
CT: control target
= control target key end

     0   :  { %10 = vsyncpa [#allocation4], 0  ;;  %s1092_s0 = inlined_call_operand.hbm [shape: f32[1,512], index: 0, kind: input, shape index: {}]   ;;  %s1093_s1 = inlined_call_operand.hbm [shape: f32[1,512], index: 1, kind: input, shape index: {}]   ;;  %s1094_s2 = inlined_call_operand.vmem [shape: f32[1,512], index: 2, kind: input, shape index: {}]   ;;  %s1095_s3 = inlined_call_operand.vmem [shape: f32[1,512], index: 3, kind: input, shape index: {}]   ;;  %s1096_s4 = inlined_call_operand.vmem [shape: f32[1,512], index: 4, kind: input, shape index: {}]   ;;  %s1097_s5 = inlined_call_operand.hbm [shape: f32[4,3], index: 5, kind: output, shape index: {}]  }
   0x1   :  { %11 = vsyncpa [#allocation7], 0 }
   0x2   :  { %12 = vsyncpa [#allocation5], 0  ;;  %s845_s18 = smov [#allocation3]   ;;  %s846_s20 = smov [#allocation6]  }
   0x3   :  { %s23_s19 = sshll.u32 %s845_s18, 4  ;;  %s37_s21 = sshll.u32 %s846_s20, 4  ;;  %s24_s19 = int_to_ptr.vmem [resolvable:$true] %s23_s19  ;;  %s38_s21 = int_to_ptr.vmem [resolvable:$true] %s37_s21 }
   0x4   :  { %s785_s24 = scalar_lea.hbm %s1092_s0, 64 }
   0x5   :  { %p786_p0 = scmp.ne.s32.totalorder %s1092_s0, %s785_s24  ;;  %p789_p1 = scmp.lt.u32.totalorder %s785_s24, %s1092_s0 }
   0x7   :  { %p791_p2 = pnand %p789_p1, %p786_p0 }
   0x9   :  { %794 = shalt.err (!%p791_p2)
}
   0xa   :  { %s795_s29 = scalar_lea.vmem %s24_s19, 64  ;;  %p800_p4 = scmp.lt.s32.totalorder %s24_s19, %s24_s19 }
   0xb   :  { %p796_p3 = scmp.ne.s32.totalorder %s24_s19, %s795_s29  ;;  %p801_p5 = scmp.lt.s32.totalorder %s795_s29, %s795_s29 }
   0xd   :  { %p802_p6 = por %p801_p5, %p800_p4 }
   0xf   :  { %p803_p7 = pnand %p802_p6, %p796_p3 }
  0x11   :  { %806 = shalt.err (!%p803_p7)
}
  0x12   :  { %26 = dma.hbm_to_vmem [thread:$0]  %s1092_s0, 64, %s24_s19, [#allocation4]  }
  0x13   :  { %s807_s9 = scalar_lea.hbm %s1093_s1, 64 }
  0x14   :  { %p808_p8 = scmp.ne.s32.totalorder %s1093_s1, %s807_s9  ;;  %p811_p9 = scmp.lt.u32.totalorder %s807_s9, %s1093_s1 }
  0x16   :  { %p813_p10 = pnand %p811_p9, %p808_p8 }
  0x18   :  { %816 = shalt.err (!%p813_p10)
}
  0x19   :  { %s817_s14 = scalar_lea.vmem %s38_s21, 64  ;;  %p822_p12 = scmp.lt.s32.totalorder %s38_s21, %s38_s21 }
  0x1a   :  { %p818_p11 = scmp.ne.s32.totalorder %s38_s21, %s817_s14  ;;  %p823_p13 = scmp.lt.s32.totalorder %s817_s14, %s817_s14 }
  0x1c   :  { %p824_p0 = por %p823_p13, %p822_p12 }
  0x1e   :  { %p825_p1 = pnand %p824_p0, %p818_p11 }
  0x20   :  { %828 = shalt.err (!%p825_p1)
}
  0x21   :  { %40 = dma.hbm_to_vmem [thread:$0]  %s1093_s1, 64, %s38_s21, [#allocation7]  }
  0x22   :  { %839 = dma.done.wait [#allocation4], 64  }
  0x23   :  { %840 = vsyncadd [#allocation4], 4294967232 }
  0x24   :  { %841 = dma.done.wait [#allocation7], 64  }
  0x25   :  { %842 = vsyncadd [#allocation7], 4294967232  ;;  %v110_v0 = vlaneseq  ;;  %v847_v2 = vmov 0.0   ;;  %v126_v3 = vld [vmem:[%s1096_s4] sm:$0xf]  ;;  %vm245_vm1 = vcmask 1040384  }
  0x26   :  { %v176_v4 = vld [vmem:[%s1094_s2] sm:$0xf]  ;;  %v129_v5 = vld [vmem:[#allocation3] sm:$0xf]  ;;  %v154_v8 = vld [vmem:[#allocation6] sm:$0xf] }
  0x27   :  { %vm903_vm0 = vcmp.lt.s32.totalorder %v110_v0, 512  ;;  %v177_v6 = vsub.f32 %v176_v4, %v126_v3  ;;  %v130_v7 = vsub.f32 %v129_v5, %v126_v3  ;;  %v198_v9 = vld [vmem:[%s1095_s3] sm:$0xf]  ;;  %v226_v10 = vshrl.u32 %v110_v0, 7  ;;  %s829_s17 = scalar_lea.hbm %s1097_s5, 64 }
  0x28   :  { %122 = vst.msk [vmem:[#allocation2 + $0x20] sm:$0xf] %vm903_vm0, %v847_v2  ;;  %114 = vst.msk [vmem:[#allocation2] sm:$0xf] %vm903_vm0, %v847_v2  ;;  %v155_v11 = vsub.f32 %v154_v8, %v126_v3  ;;  %v199_v12 = vsub.f32 %v198_v9, %v126_v3  ;;  %v127_v22 = vmul.f32 -0.5, %v126_v3  ;;  %p830_p2 = scmp.ne.s32.totalorder %s1097_s5, %s829_s17  ;;  %p833_p3 = scmp.lt.u32.totalorder %s829_s17, %s1097_s5 }
  0x29   :  { %115 = vst.msk [vmem:[#allocation2 + $0x4] sm:$0xf] %vm903_vm0, %v847_v2  ;;  %116 = vst.msk [vmem:[#allocation2 + $0x8] sm:$0xf] %vm903_vm0, %v847_v2  ;;  %v178_v13 = vand.u32 2147483647, %v177_v6 }
  0x2a   :  { %117 = vst.msk [vmem:[#allocation2 + $0xc] sm:$0xf] %vm903_vm0, %v847_v2  ;;  %118 = vst.msk [vmem:[#allocation2 + $0x10] sm:$0xf] %vm903_vm0, %v847_v2  ;;  %v131_v15 = vand.u32 2147483647, %v130_v7  ;;  %p835_p4 = pnand %p833_p3, %p830_p2 }
  0x2b   :  { %119 = vst.msk [vmem:[#allocation2 + $0x14] sm:$0xf] %vm903_vm0, %v847_v2  ;;  %120 = vst.msk [vmem:[#allocation2 + $0x18] sm:$0xf] %vm903_vm0, %v847_v2  ;;  %v156_v17 = vand.u32 2147483647, %v155_v11  ;;  %v183_v31 = vmul.f32 %v178_v13, %v178_v13 }
  0x2c   :  { %121 = vst.msk [vmem:[#allocation2 + $0x1c] sm:$0xf] %vm903_vm0, %v847_v2  ;;  %123 = vst.msk [vmem:[#allocation2 + $0x24] sm:$0xf] %vm903_vm0, %v847_v2  ;;  %v132_v21 = vsub.f32 1.0, %v131_v15  ;;  %v179_v26 = vsub.f32 1.0, %v178_v13  ;;  %v136_v33 = vmul.f32 %v131_v15, %v131_v15 }
  0x2d   :  { %124 = vst.msk [vmem:[#allocation2 + $0x28] sm:$0xf] %vm903_vm0, %v847_v2  ;;  %125 = vst.msk [vmem:[#allocation2 + $0x2c] sm:$0xf] %vm903_vm0, %v847_v2  ;;  %v157_v24 = vsub.f32 1.0, %v156_v17  ;;  %v946_v29 = vsub.s32 0, %v226_v10  ;;  %v161_v34 = vmul.f32 %v156_v17, %v156_v17 }
  0x2e   :  { %v200_v25 = vand.u32 2147483647, %v199_v12  ;;  %777 = vlog2.f32 %v132_v21  ;;  %v128_v30 = vadd.f32 0.75, %v127_v22  ;;  %v948_v36 = vsub.s32 1, %v226_v10 }
  0x2f   :  { %v195_v14 = vld [vmem:[#allocation2 + $0x20] sm:$0xf]  ;;  %779 = vlog2.f32 %v157_v24  ;;  %v950_v37 = vsub.s32 2, %v226_v10  ;;  %v952_v38 = vsub.s32 3, %v226_v10 }
  0x30   :  { %v151_v16 = vld [vmem:[#allocation2 + $0x8] sm:$0xf]  ;;  %v196_v19 = vadd.f32 %v195_v14, %v178_v13  ;;  %v201_v27 = vsub.f32 1.0, %v200_v25  ;;  %v205_v35 = vmul.f32 %v200_v25, %v200_v25  ;;  %v956_v41 = vmul.f32 %v183_v31, %v128_v30  ;;  %v139_v21 = vld [vmem:[#allocation2] sm:$0xf] }
  0x31   :  { %v152_v20 = vadd.f32 %v151_v16, %v131_v15  ;;  %v137_v42 = vmul.f32 %v136_v33, %v128_v30  ;;  %v958_v43 = vmul.f32 %v161_v34, %v128_v30 }
  0x32   :  { %v173_v18 = vld [vmem:[#allocation2 + $0x14] sm:$0xf]  ;;  %197 = vst.msk [vmem:[#allocation2 + $0x20] sm:$0xf] %vm903_vm0, %v196_v19  ;;  %781 = vlog2.f32 %v201_v27  ;;  %v960_v44 = vmul.f32 %v205_v35, %v128_v30  ;;  %v147_v30 = vld [vmem:[#allocation2 + $0x4] sm:$0xf] }
  0x33   :  { %v174_v23 = vadd.f32 %v173_v18, %v156_v17  ;;  %153 = vst.msk [vmem:[#allocation2 + $0x8] sm:$0xf] %vm903_vm0, %v152_v20  ;;  %783 = vlog2.f32 %v179_v26  ;;  %v165_v20 = vld [vmem:[#allocation2 + $0xc] sm:$0xf]  ;;  %v209_v27 = vld [vmem:[#allocation2 + $0x24] sm:$0xf] }
  0x34   :  { %v217_v28 = vld [vmem:[#allocation2 + $0x2c] sm:$0xf] }
  0x35   :  { %175 = vst.msk [vmem:[#allocation2 + $0x14] sm:$0xf] %vm903_vm0, %v174_v23  ;;  %v218_v32 = vadd.f32 %v217_v28, %v200_v25 }
  0x37   :  { %219 = vst.msk [vmem:[#allocation2 + $0x2c] sm:$0xf] %vm903_vm0, %v218_v32 }
  0x38   :  { %v778_v54 = vpop.eup %777 }
  0x39   :  { %v552_v39 = vld [vmem:[#allocation2 + $0x20] sm:$0xf]  ;;  %v780_v59 = vpop.eup %779  ;;  %v134_v14 = vmul.f32 0.6931472, %v778_v54 }
  0x3a   :  { %v306_v40 = vld [vmem:[#allocation2 + $0x8] sm:$0xf]  ;;  %v557_v45 = vrot.slane %v552_v39, %v946_v29  ;;  %v561_v46 = vrot.slane %v552_v39, %v948_v36  ;;  %v565_v47 = vrot.slane %v552_v39, %v950_v37  ;;  %v569_v48 = vrot.slane %v552_v39, %v952_v38  ;;  %v187_v39 = vld [vmem:[#allocation2 + $0x18] sm:$0xf] }
  0x3b   :  { %v311_v49 = vrot.slane %v306_v40, %v946_v29  ;;  %v315_v50 = vrot.slane %v306_v40, %v948_v36  ;;  %v319_v51 = vrot.slane %v306_v40, %v950_v37  ;;  %v323_v52 = vrot.slane %v306_v40, %v952_v38 }
  0x3c   :  { %v429_v53 = vld [vmem:[#allocation2 + $0x14] sm:$0xf]  ;;  %v574_v55 = vsel %vm245_vm1, %v557_v45, 0.0  ;;  %v575_v56 = vsel %vm245_vm1, %v561_v46, 0.0  ;;  %v577_v57 = vsel %vm245_vm1, %v565_v47, 0.0  ;;  %v579_v58 = vsel %vm245_vm1, %v569_v48, 0.0  ;;  %v782_v5 = vpop.eup %781 }
  0x3d   :  { %v576_v60 = vadd.f32 %v575_v56, %v574_v55  ;;  %v328_v61 = vsel %vm245_vm1, %v311_v49, 0.0  ;;  %v329_v62 = vsel %vm245_vm1, %v315_v50, 0.0  ;;  %v331_v63 = vsel %vm245_vm1, %v319_v51, 0.0  ;;  %v784_v10 = vpop.eup %783  ;;  %v191_v50 = vld [vmem:[#allocation2 + $0x1c] sm:$0xf] }
  0x3e   :  { %v330_v0 = vadd.f32 %v329_v62, %v328_v61  ;;  %v333_v2 = vsel %vm245_vm1, %v323_v52, 0.0  ;;  %v434_v3 = vrot.slane %v429_v53, %v946_v29  ;;  %v438_v4 = vrot.slane %v429_v53, %v948_v36  ;;  %v675_v15 = vld [vmem:[#allocation2 + $0x2c] sm:$0xf] }
  0x3f   :  { %v578_v6 = vadd.f32 %v577_v57, %v576_v60  ;;  %v442_v7 = vrot.slane %v429_v53, %v950_v37  ;;  %v446_v8 = vrot.slane %v429_v53, %v952_v38  ;;  %v159_v9 = vmul.f32 0.6931472, %v780_v59  ;;  %v169_v57 = vld [vmem:[#allocation2 + $0x10] sm:$0xf] }
  0x40   :  { %v332_v11 = vadd.f32 %v331_v63, %v330_v0  ;;  %v451_v12 = vsel %vm245_vm1, %v434_v3, 0.0  ;;  %v452_v13 = vsel %vm245_vm1, %v438_v4, 0.0  ;;  %v135_v24 = vmax.f32 %v134_v14, -100.0 }
  0x41   :  { %v580_v16 = vadd.f32 %v579_v58, %v578_v6  ;;  %v453_v17 = vadd.f32 %v452_v13, %v451_v12  ;;  %v454_v18 = vsel %vm245_vm1, %v442_v7, 0.0  ;;  %v456_v19 = vsel %vm245_vm1, %v446_v8, 0.0  ;;  %v213_v58 = vld [vmem:[#allocation2 + $0x28] sm:$0xf] }
  0x42   :  { %v334_v22 = vadd.f32 %v333_v2, %v332_v11  ;;  %v160_v23 = vmax.f32 %v159_v9, -100.0  ;;  %v203_v25 = vmul.f32 0.6931472, %v782_v5  ;;  %v181_v28 = vmul.f32 0.6931472, %v784_v10 }
  0x43   :  { %581 = vadd.xlane.f32.xlu0 %v580_v16  ;;  %v455_v26 = vadd.f32 %v454_v18, %v453_v17  ;;  %v680_v31 = vrot.slane %v675_v15, %v946_v29  ;;  %v684_v32 = vrot.slane %v675_v15, %v948_v36  ;;  %v140_v34 = vadd.f32 %v139_v21, %v135_v24 }
  0x44   :  { %335 = vadd.xlane.f32.xlu1 %v334_v22  ;;  %v166_v33 = vadd.f32 %v165_v20, %v160_v23  ;;  %v204_v35 = vmax.f32 %v203_v25, -100.0  ;;  %v138_v40 = vmul.f32 %v137_v42, %v135_v24  ;;  %v182_v46 = vmax.f32 %v181_v28, -100.0 }
  0x45   :  { %v457_v45 = vadd.f32 %v456_v19, %v455_v26  ;;  %v688_v47 = vrot.slane %v675_v15, %v950_v37  ;;  %v692_v48 = vrot.slane %v675_v15, %v952_v38  ;;  %145 = vst.msk [vmem:[#allocation2] sm:$0xf] %vm903_vm0, %v140_v34  ;;  %v697_v52 = vsel %vm245_vm1, %v680_v31, 0.0 }
  0x46   :  { %167 = vst.msk [vmem:[#allocation2 + $0xc] sm:$0xf] %vm903_vm0, %v166_v33  ;;  %v210_v49 = vadd.f32 %v209_v27, %v204_v35  ;;  %v148_v51 = vadd.f32 %v147_v30, %v138_v40  ;;  %v698_v53 = vsel %vm245_vm1, %v684_v32, 0.0  ;;  %v188_v42 = vadd.f32 %v187_v39, %v182_v46 }
  0x47   :  { %v185_v54 = vmul.f32 %v956_v41, %v182_v46  ;;  %v699_v55 = vadd.f32 %v698_v53, %v697_v52  ;;  %v700_v56 = vsel %vm245_vm1, %v688_v47, 0.0  ;;  %v163_v59 = vmul.f32 %v958_v43, %v160_v23 }
  0x48   :  { %458 = vadd.xlane.f32.xlu1 %v457_v45  ;;  %211 = vst.msk [vmem:[#allocation2 + $0x24] sm:$0xf] %vm903_vm0, %v210_v49  ;;  %149 = vst.msk [vmem:[#allocation2 + $0x4] sm:$0xf] %vm903_vm0, %v148_v51  ;;  %v207_v60 = vmul.f32 %v960_v44, %v204_v35  ;;  %v702_v62 = vsel %vm245_vm1, %v692_v48, 0.0 }
  0x49   :  { %189 = vst.msk [vmem:[#allocation2 + $0x18] sm:$0xf] %vm903_vm0, %v188_v42  ;;  %v192_v41 = vadd.f32 %v191_v50, %v185_v54  ;;  %v701_v61 = vadd.f32 %v700_v56, %v699_v55  ;;  %v170_v63 = vadd.f32 %v169_v57, %v163_v59 }
  0x4a   :  { %v214_v0 = vadd.f32 %v213_v58, %v207_v60 }
  0x4b   :  { %193 = vst.msk [vmem:[#allocation2 + $0x1c] sm:$0xf] %vm903_vm0, %v192_v41  ;;  %171 = vst.msk [vmem:[#allocation2 + $0x10] sm:$0xf] %vm903_vm0, %v170_v63  ;;  %v1013_v2 = vadd.f32 %v702_v62, %v701_v61 }
  0x4c   :  { %215 = vst.msk [vmem:[#allocation2 + $0x28] sm:$0xf] %vm903_vm0, %v214_v0  ;;  %v223_v44 = vld [vmem:[#allocation2] sm:$0xf] }
  0x4d   :  { %v347_v43 = vld [vmem:[#allocation2 + $0xc] sm:$0xf]  ;;  %v228_v7 = vrot.slane %v223_v44, %v946_v29  ;;  %v232_v8 = vrot.slane %v223_v44, %v948_v36  ;;  %v236_v9 = vrot.slane %v223_v44, %v950_v37  ;;  %v240_v1 = vrot.slane %v223_v44, %v952_v38 }
  0x4e   :  { %v352_v3 = vrot.slane %v347_v43, %v946_v29  ;;  %v356_v4 = vrot.slane %v347_v43, %v948_v36  ;;  %v360_v5 = vrot.slane %v347_v43, %v950_v37  ;;  %v364_v6 = vrot.slane %v347_v43, %v952_v38 }
  0x4f   :  { %v593_v10 = vld [vmem:[#allocation2 + $0x24] sm:$0xf]  ;;  %v246_v17 = vsel %vm245_vm1, %v228_v7, 0.0  ;;  %v247_v18 = vsel %vm245_vm1, %v232_v8, 0.0  ;;  %v249_v19 = vsel %vm245_vm1, %v236_v9, 0.0  ;;  %v251_v21 = vsel %vm245_vm1, %v240_v1, 0.0 }
  0x50   :  { %v369_v11 = vsel %vm245_vm1, %v352_v3, 0.0  ;;  %v370_v12 = vsel %vm245_vm1, %v356_v4, 0.0  ;;  %v372_v13 = vsel %vm245_vm1, %v360_v5, 0.0  ;;  %v374_v14 = vsel %vm245_vm1, %v364_v6, 0.0  ;;  %v470_v15 = vld [vmem:[#allocation2 + $0x18] sm:$0xf] }
  0x51   :  { %v371_v16 = vadd.f32 %v370_v12, %v369_v11  ;;  %v248_v20 = vadd.f32 %v247_v18, %v246_v17  ;;  %v598_v22 = vrot.slane %v593_v10, %v946_v29  ;;  %v602_v23 = vrot.slane %v593_v10, %v948_v36  ;;  %v265_v53 = vld [vmem:[#allocation2 + $0x4] sm:$0xf] }
  0x52   :  { %v606_v25 = vrot.slane %v593_v10, %v950_v37  ;;  %v610_v26 = vrot.slane %v593_v10, %v952_v38  ;;  %v475_v27 = vrot.slane %v470_v15, %v946_v29  ;;  %v479_v32 = vrot.slane %v470_v15, %v948_v36  ;;  %v511_v33 = vld [vmem:[#allocation2 + $0x1c] sm:$0xf]  ;;  %v388_v41 = vld [vmem:[#allocation2 + $0x10] sm:$0xf] }
  0x53   :  { %v373_v24 = vadd.f32 %v372_v13, %v371_v16  ;;  %v250_v28 = vadd.f32 %v249_v19, %v248_v20  ;;  %v615_v30 = vsel %vm245_vm1, %v598_v22, 0.0  ;;  %v616_v31 = vsel %vm245_vm1, %v602_v23, 0.0  ;;  %v634_v9 = vld [vmem:[#allocation2 + $0x28] sm:$0xf] }
  0x54   :  { %v617_v35 = vadd.f32 %v616_v31, %v615_v30  ;;  %v618_v39 = vsel %vm245_vm1, %v606_v25, 0.0  ;;  %v620_v40 = vsel %vm245_vm1, %v610_v26, 0.0  ;;  %v483_v46 = vrot.slane %v470_v15, %v950_v37 }
  0x55   :  { %v375_v34 = vadd.f32 %v374_v14, %v373_v24  ;;  %v252_v45 = vadd.f32 %v251_v21, %v250_v28  ;;  %v487_v47 = vrot.slane %v470_v15, %v952_v38  ;;  %v492_v48 = vsel %vm245_vm1, %v475_v27, 0.0 }
  0x56   :  { %v619_v49 = vadd.f32 %v618_v39, %v617_v35  ;;  %v493_v50 = vsel %vm245_vm1, %v479_v32, 0.0  ;;  %v516_v51 = vrot.slane %v511_v33, %v946_v29  ;;  %v520_v52 = vrot.slane %v511_v33, %v948_v36 }
  0x57   :  { %376 = vadd.xlane.f32.xlu1 %v375_v34  ;;  %253 = vadd.xlane.f32.xlu0 %v252_v45  ;;  %v494_v42 = vadd.f32 %v493_v50, %v492_v48  ;;  %v495_v54 = vsel %vm245_vm1, %v483_v46, 0.0  ;;  %v497_v55 = vsel %vm245_vm1, %v487_v47, 0.0  ;;  %v524_v56 = vrot.slane %v511_v33, %v950_v37 }
  0x58   :  { %v621_v57 = vadd.f32 %v620_v40, %v619_v49  ;;  %v528_v58 = vrot.slane %v511_v33, %v952_v38  ;;  %v533_v59 = vsel %vm245_vm1, %v516_v51, 0.0  ;;  %v534_v60 = vsel %vm245_vm1, %v520_v52, 0.0 }
  0x59   :  { %v496_v61 = vadd.f32 %v495_v54, %v494_v42  ;;  %v535_v62 = vadd.f32 %v534_v60, %v533_v59  ;;  %v536_v63 = vsel %vm245_vm1, %v524_v56, 0.0  ;;  %v270_v0 = vrot.slane %v265_v53, %v946_v29 }
  0x5a   :  { %v538_v43 = vsel %vm245_vm1, %v528_v58, 0.0  ;;  %v274_v44 = vrot.slane %v265_v53, %v948_v36  ;;  %v278_v3 = vrot.slane %v265_v53, %v950_v37  ;;  %v282_v4 = vrot.slane %v265_v53, %v952_v38 }
  0x5b   :  { %622 = vadd.xlane.f32.xlu1 %v621_v57  ;;  %v498_v5 = vadd.f32 %v497_v55, %v496_v61  ;;  %v537_v6 = vadd.f32 %v536_v63, %v535_v62  ;;  %v287_v7 = vsel %vm245_vm1, %v270_v0, 0.0  ;;  %v393_v8 = vrot.slane %v388_v41, %v946_v29 }
  0x5c   :  { %v288_v1 = vsel %vm245_vm1, %v274_v44, 0.0  ;;  %v290_v10 = vsel %vm245_vm1, %v278_v3, 0.0  ;;  %v292_v11 = vsel %vm245_vm1, %v282_v4, 0.0  ;;  %v397_v12 = vrot.slane %v388_v41, %v948_v36 }
  0x5d   :  { %499 = vadd.xlane.f32.xlu0 %v498_v5  ;;  %v539_v13 = vadd.f32 %v538_v43, %v537_v6  ;;  %v289_v14 = vadd.f32 %v288_v1, %v287_v7  ;;  %v401_v15 = vrot.slane %v388_v41, %v950_v37  ;;  %v405_v16 = vrot.slane %v388_v41, %v952_v38 }
  0x5e   :  { %v410_v17 = vsel %vm245_vm1, %v393_v8, 0.0  ;;  %v411_v18 = vsel %vm245_vm1, %v397_v12, 0.0  ;;  %v639_v19 = vrot.slane %v634_v9, %v946_v29  ;;  %v643_v20 = vrot.slane %v634_v9, %v948_v36 }
  0x5f   :  { %540 = vadd.xlane.f32.xlu1 %v539_v13  ;;  %v291_v21 = vadd.f32 %v290_v10, %v289_v14  ;;  %v412_v22 = vadd.f32 %v411_v18, %v410_v17  ;;  %v413_v23 = vsel %vm245_vm1, %v401_v15, 0.0  ;;  %v415_v24 = vsel %vm245_vm1, %v405_v16, 0.0 }
  0x60   :  { %v647_v25 = vrot.slane %v634_v9, %v950_v37  ;;  %v651_v26 = vrot.slane %v634_v9, %v952_v38  ;;  %v656_v27 = vsel %vm245_vm1, %v639_v19, 0.0  ;;  %v657_v28 = vsel %vm245_vm1, %v643_v20, 0.0 }
  0x61   :  { %v293_v30 = vadd.f32 %v292_v11, %v291_v21  ;;  %v414_v31 = vadd.f32 %v413_v23, %v412_v22  ;;  %v658_v29 = vadd.f32 %v657_v28, %v656_v27 }
  0x62   :  { %v659_v36 = vsel %vm245_vm1, %v647_v25, 0.0  ;;  %v661_v34 = vsel %vm245_vm1, %v651_v26, 0.0 }
  0x63   :  { %294 = vadd.xlane.f32.xlu0 %v293_v30  ;;  %704 = vadd.xlane.f32.xlu1 %v1013_v2  ;;  %v416_v32 = vadd.f32 %v415_v24, %v414_v31  ;;  %v660_v33 = vadd.f32 %v659_v36, %v658_v29 }
  0x65   :  { %v662_v37 = vadd.f32 %v661_v34, %v660_v33 }
  0x67   :  { %417 = vadd.xlane.f32.xlu0 %v416_v32 }
  0x6b   :  { %663 = vadd.xlane.f32.xlu0 %v662_v37 }
  0xd0   :  { %v582_v39 = vpop.xlane.xlu0 %581 }
  0xd1   :  { %v336_v38 = vpop.xlane.xlu1 %335  ;;  %v583_v59 = vrot.slane %v582_v39, 4 }
  0xd2   :  { %v337_v49 = vrot.slane %v336_v38, 4 }
  0xd3   :  { %v584_v6 = vadd.f32 %v583_v59, %v582_v39 }
  0xd4   :  { %v338_v53 = vadd.f32 %v337_v49, %v336_v38 }
  0xd5   :  { %v459_v35 = vpop.xlane.xlu1 %458  ;;  %v585_v17 = vrot.slane %v584_v6, 2 }
  0xd6   :  { %v460_v42 = vrot.slane %v459_v35, 4  ;;  %v339_v41 = vrot.slane %v338_v53, 2 }
  0xd7   :  { %v586_v33 = vadd.f32 %v585_v17, %v584_v6 }
  0xd8   :  { %v461_v61 = vadd.f32 %v460_v42, %v459_v35  ;;  %v340_v10 = vadd.f32 %v339_v41, %v338_v53 }
  0xda   :  { %v462_v8 = vrot.slane %v461_v61, 2  ;;  %v341_v22 = vrot.slane %v340_v10, 1 }
  0xdc   :  { %v463_v24 = vadd.f32 %v462_v8, %v461_v61  ;;  %v342_v34 = vadd.f32 %v341_v22, %v340_v10 }
  0xde   :  { %v464_v37 = vrot.slane %v463_v24, 1 }
  0xe4   :  { %v377_v40 = vpop.xlane.xlu1 %376  ;;  %v254_v45 = vpop.xlane.xlu0 %253 }
  0xe5   :  { %v255_v46 = vrot.slane %v254_v45, 4  ;;  %v378_v50 = vrot.slane %v377_v40, 4 }
  0xe7   :  { %v256_v47 = vadd.f32 %v255_v46, %v254_v45  ;;  %v379_v54 = vadd.f32 %v378_v50, %v377_v40  ;;  %v587_v50 = vrot.slane %v586_v33, 1 }
  0xe8   :  { %v623_v48 = vpop.xlane.xlu1 %622 }
  0xe9   :  { %v257_v51 = vrot.slane %v256_v47, 2  ;;  %v380_v62 = vrot.slane %v379_v54, 2  ;;  %v624_v63 = vrot.slane %v623_v48, 4 }
  0xea   :  { %v500_v52 = vpop.xlane.xlu0 %499 }
  0xeb   :  { %v258_v2 = vadd.f32 %v257_v51, %v256_v47  ;;  %v501_v56 = vrot.slane %v500_v52, 4  ;;  %v625_v9 = vadd.f32 %v624_v63, %v623_v48  ;;  %v381_v11 = vadd.f32 %v380_v62, %v379_v54 }
  0xec   :  { %v541_v55 = vpop.xlane.xlu1 %540  ;;  %v465_v51 = vadd.f32 %v464_v37, %v463_v24 }
  0xed   :  { %v259_v57 = vrot.slane %v258_v2, 1  ;;  %v542_v58 = vrot.slane %v541_v55, 4  ;;  %v502_v44 = vadd.f32 %v501_v56, %v500_v52  ;;  %v626_v20 = vrot.slane %v625_v9, 2 }
  0xee   :  { %v382_v23 = vrot.slane %v381_v11, 1 }
  0xef   :  { %v260_v60 = vadd.f32 %v259_v57, %v258_v2  ;;  %v543_v4 = vadd.f32 %v542_v58, %v541_v55  ;;  %v503_v12 = vrot.slane %v502_v44, 2  ;;  %v627_v38 = vadd.f32 %v626_v20, %v625_v9 }
  0xf0   :  { %v295_v0 = vpop.xlane.xlu0 %294  ;;  %v705_v43 = vpop.xlane.xlu1 %704  ;;  %v383_v39 = vadd.f32 %v382_v23, %v381_v11  ;;  %v588_v55 = vadd.f32 %v587_v50, %v586_v33 }
  0xf1   :  { %v296_v3 = vrot.slane %v295_v0, 4  ;;  %749 = vpush %v260_v60  ;;  %v706_v5 = vrot.slane %v705_v43, 4  ;;  %v544_v15 = vrot.slane %v543_v4, 2  ;;  %v504_v28 = vadd.f32 %v503_v12, %v502_v44 }
  0xf2   :  { %v628_v52 = vrot.slane %v627_v38, 1 }
  0xf3   :  { %v297_v7 = vadd.f32 %v296_v3, %v295_v0  ;;  %v707_v16 = vadd.f32 %v706_v5, %v705_v43  ;;  %v545_v31 = vadd.f32 %v544_v15, %v543_v4  ;;  %v505_v45 = vrot.slane %v504_v28, 1 }
  0xf4   :  { %v418_v1 = vpop.xlane.xlu0 %417  ;;  %v629_v57 = vadd.f32 %v628_v52, %v627_v38 }
  0xf5   :  { %v298_v13 = vrot.slane %v297_v7, 2  ;;  %v419_v14 = vrot.slane %v418_v1, 4  ;;  %v708_v30 = vrot.slane %v707_v16, 2  ;;  %v546_v47 = vrot.slane %v545_v31, 1 }
  0xf6   :  { %v506_v2 = vadd.f32 %v505_v45, %v504_v28 }
  0xf7   :  { %v420_v18 = vadd.f32 %v419_v14, %v418_v1  ;;  %v299_v19 = vadd.f32 %v298_v13, %v297_v7  ;;  %v709_v46 = vadd.f32 %v708_v30, %v707_v16  ;;  %v547_v42 = vadd.f32 %v546_v47, %v545_v31 }
  0xf8   :  { %v664_v21 = vpop.xlane.xlu0 %663 }
  0xf9   :  { %v421_v25 = vrot.slane %v420_v18, 2  ;;  %v665_v26 = vrot.slane %v664_v21, 4  ;;  %v300_v27 = vrot.slane %v299_v19, 1  ;;  %v710_v54 = vrot.slane %v709_v46, 1 }
  0xfb   :  { %v666_v29 = vadd.f32 %v665_v26, %v664_v21  ;;  %v301_v36 = vadd.f32 %v300_v27, %v299_v19  ;;  %v422_v32 = vadd.f32 %v421_v25, %v420_v18  ;;  %v711_v58 = vadd.f32 %v710_v54, %v709_v46 }
  0xfd   :  { %v667_v35 = vrot.slane %v666_v29, 2  ;;  %751 = vpush %v301_v36  ;;  %v423_v40 = vrot.slane %v422_v32, 1 }
  0xfe   :  { %753 = vpush %v342_v34 }
  0xff   :  { %v668_v48 = vadd.f32 %v667_v35, %v666_v29  ;;  %755 = vpush %v383_v39  ;;  %v424_v49 = vadd.f32 %v423_v40, %v422_v32 }
 0x101   :  { %757 = vpush %v424_v49  ;;  %v669_v53 = vrot.slane %v668_v48, 1 }
 0x102   :  { %759 = vpush %v465_v51 }
 0x103   :  { %761 = vpush %v506_v2  ;;  %v670_v56 = vadd.f32 %v669_v53, %v668_v48 }
 0x104   :  { %763 = vpush %v547_v42 }
 0x105   :  { %765 = vpush %v588_v55 }
 0x106   :  { %767 = vpush %v629_v57 }
 0x107   :  { %769 = vpush %v670_v56 }
 0x108   :  { %771 = vpush %v711_v58 }
 0x122   :  { %s750_s2 = spop %749 }
 0x123   :  { %s262_s3 = smul.f32 -0.001953125, %s750_s2 }
 0x125   :  { %264 = sst [smem:[#allocation8]] %s262_s3 }
 0x12e   :  { %s752_s4 = spop %751 }
 0x12f   :  { %s303_s21 = smul.f32 -0.001953125, %s752_s4  ;;  %s754_s22 = spop %753 }
 0x130   :  { %s344_s23 = smul.f32 0.001953125, %s754_s22  ;;  %s756_s24 = spop %755 }
 0x131   :  { %305 = sst [smem:[#allocation8 + $0x1]] %s303_s21  ;;  %s385_s25 = smul.f32 -0.001953125, %s756_s24 }
 0x132   :  { %346 = sst [smem:[#allocation8 + $0x2]] %s344_s23  ;;  %s758_s26 = spop %757 }
 0x133   :  { %387 = sst [smem:[#allocation8 + $0x80]] %s385_s25  ;;  %s426_s27 = smul.f32 -0.001953125, %s758_s26 }
 0x134   :  { %s760_s28 = spop %759 }
 0x135   :  { %428 = sst [smem:[#allocation8 + $0x81]] %s426_s27  ;;  %s467_s29 = smul.f32 0.001953125, %s760_s28 }
 0x136   :  { %s762_s30 = spop %761 }
 0x137   :  { %469 = sst [smem:[#allocation8 + $0x82]] %s467_s29  ;;  %s508_s6 = smul.f32 -0.001953125, %s762_s30 }
 0x138   :  { %s764_s7 = spop %763 }
 0x139   :  { %510 = sst [smem:[#allocation8 + $0x100]] %s508_s6  ;;  %s549_s8 = smul.f32 -0.001953125, %s764_s7 }
 0x13a   :  { %s766_s9 = spop %765 }
 0x13b   :  { %551 = sst [smem:[#allocation8 + $0x101]] %s549_s8  ;;  %s590_s10 = smul.f32 0.001953125, %s766_s9 }
 0x13c   :  { %s768_s11 = spop %767 }
 0x13d   :  { %592 = sst [smem:[#allocation8 + $0x102]] %s590_s10  ;;  %s631_s12 = smul.f32 -0.001953125, %s768_s11 }
 0x13e   :  { %s770_s13 = spop %769 }
 0x13f   :  { %633 = sst [smem:[#allocation8 + $0x180]] %s631_s12  ;;  %s672_s14 = smul.f32 -0.001953125, %s770_s13 }
 0x140   :  { %s772_s0 = spop %771 }
 0x141   :  { %674 = sst [smem:[#allocation8 + $0x181]] %s672_s14  ;;  %s713_s15 = smul.f32 0.001953125, %s772_s0 }
 0x143   :  { %715 = sst [smem:[#allocation8 + $0x182]] %s713_s15 }
 0x144   :  { %838 = shalt.err (!%p835_p4)
}
 0x145   :  { %s848_s3 = smov [#allocation8]  }
 0x146   :  { %723 = dma.smem_to_hbm %s848_s3, 64, %s1097_s5, [#allocation5]  }
 0x147   :  { %843 = dma.done.wait [#allocation5], 64  }
 0x148   :  { %844 = vsyncadd [#allocation5], 4294967232 }
 0x149   :  { %727 = sfence }
 0x14a   :  { %728 = vsyncpa [#allocation4], 1 }
 0x14b   :  { %729 = vsyncpa [#allocation7], 1 }
 0x14c   :  { %730 = vsyncpa [#allocation5], 1 }

</bundles_post_ra>
